<compile_context>
chip_gen: v7x
topology: tpu7x:2x2x1
jax: 0.10.0
libtpu: 0.0.40
codegen_flags: <defaults>
</compile_context>

<pallas_src>
import functools

import jax
import jax.numpy as jnp
from jax.experimental import pallas as pl
from jax.experimental.pallas import tpu as pltpu

BN_EPS = 1e-5
_ROW_Q = 16        # row quantum: keeps bf16 (16,128) sublane packing aligned
_MAX_ROWS = 2048   # cap on row tiles (amortizes per-grid-step overhead)


def _round_up(v, m):
    return ((v + m - 1) // m) * m


def _vmem_budget_bytes():
    """~75% of physical VMEM; conservative v7x fallback (64 MiB) if unknown."""
    cap = None
    try:
        cap = getattr(pltpu.get_tpu_info(), "vmem_capacity_bytes", None)
    except Exception:
        cap = None
    if not cap:
        cap = 64 * 1024 * 1024
    return int(cap) * 3 // 4


def _fit_rows(budget, fixed_bytes, per_row_bytes, cap_rows):
    avail = budget - fixed_bytes
    rows = avail // per_row_bytes if avail > 0 else 0
    rows = min(int(rows), int(cap_rows), _MAX_ROWS)
    rows = (rows // _ROW_Q) * _ROW_Q
    return max(rows, _ROW_Q)


# ---------------------------------------------------------------------------
# Fused path: one pallas_call, grid = (phase, row_tile), h resident in VMEM.
# ---------------------------------------------------------------------------
def _fused_kernel(eps_ref, x_ref, agg_ref, w0_ref, g0_ref, b0_ref, w1_ref,
                  b1_ref, o_ref, h_vmem, stats_ref, scale_ref, shift_ref,
                  *, inv_n, mm_dtype, tm):
    phase = pl.program_id(0)
    i = pl.program_id(1)
    row0 = pl.multiple_of(i * tm, tm)

    @pl.when(phase == 0)
    def _compute_h_and_stats():
        @pl.when(i == 0)
        def _init():
            stats_ref[...] = jnp.zeros_like(stats_ref)

        z = agg_ref[...] + (1.0 + eps_ref[0, 0]) * x_ref[...]
        h = jnp.dot(z.astype(mm_dtype), w0_ref[...],
                    preferred_element_type=jnp.float32)
        # Single-pass E[x^2]-E[x]^2 in f32 (clamped when folding).
        # TODO(synk): mean-shifted / Chan accumulation if |mean| >> std.
        stats_ref[0:1, :] += jnp.sum(h, axis=0, keepdims=True)
        stats_ref[1:2, :] += jnp.sum(h * h, axis=0, keepdims=True)
        h_vmem[pl.ds(row0, tm), :] = h.astype(h_vmem.dtype)

    @pl.when(phase == 1)
    def _bn_relu_lin1():
        @pl.when(i == 0)
        def _fold_bn():
            mean = stats_ref[0:1, :] * inv_n
            ex2 = stats_ref[1:2, :] * inv_n
            var = jnp.maximum(ex2 - mean * mean, 0.0)
            scale = g0_ref[...] * jax.lax.rsqrt(var + BN_EPS)
            scale_ref[...] = scale
            shift_ref[...] = b0_ref[...] - mean * scale

        h = h_vmem[pl.ds(row0, tm), :].astype(jnp.float32)
        hn = jnp.maximum(h * scale_ref[...] + shift_ref[...], 0.0)
        y = jnp.dot(hn.astype(mm_dtype), w1_ref[...],
                    preferred_element_type=jnp.float32) + b1_ref[...]
        o_ref[...] = y.astype(o_ref.dtype)


# ---------------------------------------------------------------------------
# Two-pass fallback, pass A: z = agg+(1+eps)x ; h = z@W0 (bf16 out) ; BN stats.
# ---------------------------------------------------------------------------
def _lin0_stats_kernel(eps_ref, x_ref, agg_ref, w0_ref, h_ref, stats_ref,
                       *, mm_dtype):
    i = pl.program_id(1)

    @pl.when(i == 0)
    def _init():
        stats_ref[...] = jnp.zeros_like(stats_ref)

    z = agg_ref[...] + (1.0 + eps_ref[0, 0]) * x_ref[...]
    h = jnp.dot(z.astype(mm_dtype), w0_ref[...],
                preferred_element_type=jnp.float32)
    h_ref[...] = h.astype(h_ref.dtype)   # bf16 store: halves the h HBM traffic
    stats_ref[0:1, :] += jnp.sum(h, axis=0, keepdims=True)
    stats_ref[1:2, :] += jnp.sum(h * h, axis=0, keepdims=True)


# ---------------------------------------------------------------------------
# Two-pass fallback, pass B: folded BN (scale/shift FMA) + ReLU + Linear1.
# ---------------------------------------------------------------------------
def _bn_relu_lin1_kernel(h_ref, scale_ref, shift_ref, w1_ref, b1_ref, o_ref,
                         *, mm_dtype):
    hn = jnp.maximum(h_ref[...].astype(jnp.float32) * scale_ref[...]
                     + shift_ref[...], 0.0)
    y = jnp.dot(hn.astype(mm_dtype), w1_ref[...],
                preferred_element_type=jnp.float32) + b1_ref[...]
    o_ref[...] = y.astype(o_ref.dtype)


# ---------------------------------------------------------------------------
# Wrapper
# ---------------------------------------------------------------------------
def gine_conv_forward(x, edge_index, edge_attr, eps, w0, g0, b0, w1, b1,
                      *, block_rows=None, mm_dtype=jnp.bfloat16,
                      force_two_pass=False):
    """GINEConv forward.

    x: (N, nin) node features.     edge_index: (2, E) int32 [src; dst].
    edge_attr: (E, nin).           eps: scalar (train_eps parameter).
    w0: (nin, nhid) Linear0 weight transposed to (in, out), no bias.
    g0, b0: (nhid,) BatchNorm1d affine parameters.
    w1: (nhid, nout) Linear1 weight (in, out).   b1: (nout,) Linear1 bias.
    block_rows: optional cap on the row tile (None -> derived from VMEM).
    """
    n, nin = x.shape
    nhid = w0.shape[1]
    nout = w1.shape[1]
    f32 = jnp.float32

    # ---- GINE message passing: gather + ReLU + scatter-add over edge dst ----
    # TODO(synk): the data-dependent scatter-add over edge destinations has no
    # clean BlockSpec expression (needs dst-sorted CSR + scalar-prefetch row
    # offsets + manual DMA / one-hot MXU scatter); kept in JAX/XLA.
    src = edge_index[0]
    dst = edge_index[1]
    msg = jnp.maximum(x[src] + edge_attr, 0.0)
    agg = jax.ops.segment_sum(msg, dst, num_segments=n)

    # ---- padding: lane-dense feature dims (x128), rows to the tile quantum ----
    nin_p = _round_up(nin, 128)
    nhid_p = _round_up(nhid, 128)
    nout_p = _round_up(nout, 128)
    w_it = jnp.dtype(mm_dtype).itemsize

    budget = _vmem_budget_bytes()
    cap_rows = (_MAX_ROWS if block_rows is None
                else max(_ROW_Q, (int(block_rows) // _ROW_Q) * _ROW_Q))

    # TODO(synk): tile W0/W1 over output columns (extra grid axis) when the
    # 2x-buffered weights alone exceed the VMEM budget (very large nhid on v7x).

    # -- fused-path sizing: h lives in a bf16 VMEM scratch, no HBM round-trip --
    fix_f = (2 * (nin_p * nhid_p + nhid_p * nout_p) * w_it   # W0, W1 (x2 bufs)
             + 2 * (2 * nhid_p + nout_p) * 4                 # gamma, beta, b1
             + 4 * nhid_p * 4)                               # stats/scale/shift
    row_f = 2 * (2 * nin_p * 4 + nout_p * 4)                 # x, agg in; o out
    h_est = _round_up(max(n, 1), _ROW_Q) * nhid_p * w_it
    tm_f = _fit_rows(budget, fix_f + h_est, row_f,
                     min(cap_rows, _round_up(max(n, 1), _ROW_Q)))
    n_pf = _round_up(max(n, 1), tm_f)
    fused_bytes = fix_f + n_pf * nhid_p * w_it + tm_f * row_f
    use_fused = (not force_two_pass) and fused_bytes <= budget

    eps_arr = jnp.asarray(eps, f32).reshape(1, 1)
    g0_p = jnp.zeros((1, nhid_p), f32).at[0, :nhid].set(g0.astype(f32))
    b0_p = jnp.zeros((1, nhid_p), f32).at[0, :nhid].set(b0.astype(f32))
    b1_p = jnp.zeros((1, nout_p), f32).at[0, :nout].set(b1.astype(f32))
    w0_p = jnp.zeros((nin_p, nhid_p), mm_dtype).at[:nin, :nhid].set(
        w0.astype(mm_dtype))
    w1_p = jnp.zeros((nhid_p, nout_p), mm_dtype).at[:nhid, :nout].set(
        w1.astype(mm_dtype))

    def _pad_rows(a, rows):
        return jnp.zeros((rows, nin_p), f32).at[:n, :nin].set(a.astype(f32))

    # ------------------------------ fused path -------------------------------
    if use_fused:
        tm = tm_f
        n_p = n_pf
        x_p = _pad_rows(x, n_p)
        agg_p = _pad_rows(agg, n_p)
        cost = pl.CostEstimate(
            flops=2 * n_p * nhid_p * (nin_p + nout_p) + 8 * n_p * nhid_p,
            transcendentals=nhid_p,
            bytes_accessed=(2 * n_p * nin_p * 4 + n_p * nout_p * 4
                            + (nin_p * nhid_p + nhid_p * nout_p) * w_it),
        )
        y_p = pl.pallas_call(
            functools.partial(_fused_kernel, inv_n=1.0 / n, mm_dtype=mm_dtype,
                              tm=tm),
            grid=(2, n_p // tm),
            in_specs=[
                pl.BlockSpec(memory_space=pltpu.MemorySpace.SMEM),        # eps
                pl.BlockSpec((tm, nin_p), lambda p, i: (i * (1 - p), 0)),  # x
                pl.BlockSpec((tm, nin_p), lambda p, i: (i * (1 - p), 0)),  # agg
                pl.BlockSpec((nin_p, nhid_p), lambda p, i: (0, 0)),        # W0
                pl.BlockSpec((1, nhid_p), lambda p, i: (0, 0)),            # gamma
                pl.BlockSpec((1, nhid_p), lambda p, i: (0, 0)),            # beta
                pl.BlockSpec((nhid_p, nout_p), lambda p, i: (0, 0)),       # W1
                pl.BlockSpec((1, nout_p), lambda p, i: (0, 0)),            # b1
            ],
            out_specs=pl.BlockSpec((tm, nout_p), lambda p, i: (i * p, 0)),
            out_shape=jax.ShapeDtypeStruct((n_p, nout_p), f32),
            scratch_shapes=[
                pltpu.VMEM((n_p, nhid_p), mm_dtype),   # h, VMEM-resident (bf16)
                pltpu.VMEM((2, nhid_p), f32),          # sum / sum-of-squares
                pltpu.VMEM((1, nhid_p), f32),          # folded BN scale
                pltpu.VMEM((1, nhid_p), f32),          # folded BN shift
            ],
            compiler_params=pltpu.CompilerParams(
                dimension_semantics=("arbitrary", "arbitrary"),
                vmem_limit_bytes=budget),
            cost_estimate=cost,
        )(eps_arr, x_p, agg_p, w0_p, g0_p, b0_p, w1_p, b1_p)
        return y_p[:n, :nout]

    # --------------------------- two-pass fallback ---------------------------
    nc = 2 if n >= 2 * _ROW_Q else 1   # per-core partial stats (v7x megacore)

    fix_a = 2 * nin_p * nhid_p * w_it + 2 * 2 * nhid_p * 4
    row_a = 2 * (2 * nin_p * 4 + nhid_p * w_it)
    fix_b = 2 * (nhid_p * nout_p * w_it + 2 * nhid_p * 4 + nout_p * 4)
    row_b = 2 * (nhid_p * w_it + nout_p * 4)
    cap2 = min(cap_rows, _round_up(pl.cdiv(max(n, 1), nc), _ROW_Q))
    tm = min(_fit_rows(budget, fix_a, row_a, cap2),
             _fit_rows(budget, fix_b, row_b, cap2))
    n_p = _round_up(max(n, 1), nc * tm)
    tiles_per_core = n_p // (nc * tm)

    x_p = _pad_rows(x, n_p)
    agg_p = _pad_rows(agg, n_p)

    cost_a = pl.CostEstimate(
        flops=2 * n_p * nin_p * nhid_p + 7 * n_p * nhid_p,
        transcendentals=0,
        bytes_accessed=(2 * n_p * nin_p * 4 + nin_p * nhid_p * w_it
                        + n_p * nhid_p * w_it + nc * 2 * nhid_p * 4),
    )
    h_p, stats = pl.pallas_call(
        functools.partial(_lin0_stats_kernel, mm_dtype=mm_dtype),
        grid=(nc, tiles_per_core),
        in_specs=[
            pl.BlockSpec(memory_space=pltpu.MemorySpace.SMEM),             # eps
            pl.BlockSpec((tm, nin_p), lambda c, i: (c * tiles_per_core + i, 0)),
            pl.BlockSpec((tm, nin_p), lambda c, i: (c * tiles_per_core + i, 0)),
            pl.BlockSpec((nin_p, nhid_p), lambda c, i: (0, 0)),            # W0
        ],
        out_specs=(
            pl.BlockSpec((tm, nhid_p), lambda c, i: (c * tiles_per_core + i, 0)),
            pl.BlockSpec((2, nhid_p), lambda c, i: (0, c)),     # per-core stats
        ),
        out_shape=(
            jax.ShapeDtypeStruct((n_p, nhid_p), mm_dtype),      # h in bf16
            jax.ShapeDtypeStruct((2, nc * nhid_p), jnp.float32),
        ),
        compiler_params=pltpu.CompilerParams(
            dimension_semantics=("parallel", "arbitrary"),
            vmem_limit_bytes=budget),
        cost_estimate=cost_a,
    )(eps_arr, x_p, agg_p, w0_p)

    # Fold BN once in the wrapper (combine per-core partials) -> scale/shift.
    stats_c = stats.reshape(2, nc, nhid_p).sum(axis=1)
    mean = stats_c[0:1, :] / n
    ex2 = stats_c[1:2, :] / n
    var = jnp.maximum(ex2 - mean * mean, 0.0)
    scale = g0_p * jax.lax.rsqrt(var + BN_EPS)
    shift = b0_p - mean * scale

    cost_b = pl.CostEstimate(
        flops=2 * n_p * nhid_p * nout_p + 3 * n_p * nhid_p,
        transcendentals=0,
        bytes_accessed=(n_p * nhid_p * w_it + nhid_p * nout_p * w_it
                        + n_p * nout_p * 4 + 2 * nhid_p * 4 + nout_p * 4),
    )
    y_p = pl.pallas_call(
        functools.partial(_bn_relu_lin1_kernel, mm_dtype=mm_dtype),
        grid=(n_p // tm,),
        in_specs=[
            pl.BlockSpec((tm, nhid_p), lambda i: (i, 0)),       # h tile (bf16)
            pl.BlockSpec((1, nhid_p), lambda i: (0, 0)),        # scale
            pl.BlockSpec((1, nhid_p), lambda i: (0, 0)),        # shift
            pl.BlockSpec((nhid_p, nout_p), lambda i: (0, 0)),   # W1 (resident)
            pl.BlockSpec((1, nout_p), lambda i: (0, 0)),        # b1
        ],
        out_specs=pl.BlockSpec((tm, nout_p), lambda i: (i, 0)),
        out_shape=jax.ShapeDtypeStruct((n_p, nout_p), f32),
        compiler_params=pltpu.CompilerParams(
            dimension_semantics=("parallel",),
            vmem_limit_bytes=budget),
        cost_estimate=cost_b,
    )(h_p, scale, shift, w1_p, b1_p)

    return y_p[:n, :nout]


# ---------------------------------------------------------------------------
# References
# ---------------------------------------------------------------------------
def _reference_f32(x, edge_index, edge_attr, eps, w0, g0, b0, w1, b1):
    src, dst = edge_index[0], edge_index[1]
    msg = jnp.maximum(x[src] + edge_attr, 0.0)
    agg = jax.ops.segment_sum(msg, dst, num_segments=x.shape[0])
    z = agg + (1.0 + eps) * x
    h = z @ w0
    m = jnp.mean(h, axis=0, keepdims=True)
    v = jnp.mean((h - m) ** 2, axis=0, keepdims=True)
    hn = jnp.maximum((h - m) * jax.lax.rsqrt(v + BN_EPS) * g0[None, :]
                     + b0[None, :], 0.0)
    return hn @ w1 + b1[None, :]


def _reference_matched(x, edge_index, edge_attr, eps, w0, g0, b0, w1, b1,
                       mm_dtype=jnp.bfloat16):
    # Mirrors the kernel math: bf16 MXU operands, f32 accum, bf16-stored h,
    # stats from the f32 h, single-pass variance, folded scale/shift.
    src, dst = edge_index[0], edge_index[1]
    msg = jnp.maximum(x[src] + edge_attr, 0.0)
    agg = jax.ops.segment_sum(msg, dst, num_segments=x.shape[0])
    z = agg + (1.0 + eps) * x
    h = jnp.dot(z.astype(mm_dtype), w0.astype(mm_dtype),
                preferred_element_type=jnp.float32)
    n = x.shape[0]
    mean = jnp.sum(h, axis=0, keepdims=True) / n
    ex2 = jnp.sum(h * h, axis=0, keepdims=True) / n
    var = jnp.maximum(ex2 - mean * mean, 0.0)
    scale = g0[None, :] * jax.lax.rsqrt(var + BN_EPS)
    shift = b0[None, :] - mean * scale
    h_q = h.astype(mm_dtype).astype(jnp.float32)
    hn = jnp.maximum(h_q * scale + shift, 0.0)
    return jnp.dot(hn.astype(mm_dtype), w1.astype(mm_dtype),
                   preferred_element_type=jnp.float32) + b1[None, :]


if __name__ == "__main__":
    N, NIN, NOUT, E = 64, 32, 16, 256   # nlayer=2 -> hidden dim = NIN

    key = jax.random.PRNGKey(0)
    kx, ke, ki, kw0, kw1, kb1, kg0, kb0 = jax.random.split(key, 8)

    x = jax.random.normal(kx, (N, NIN), jnp.float32)
    edge_attr = jax.random.normal(ke, (E, NIN), jnp.float32)
    edge_index = jax.random.randint(ki, (2, E), 0, N, dtype=jnp.int32)

    bound = 1.0 / (NIN ** 0.5)
    # Linear weights passed transposed to (in, out); Linear0 bias=False,
    # Linear1 bias=True per MLP(nin, nout, 2, with_final_activation=False).
    w0 = jax.random.uniform(kw0, (NIN, NIN), jnp.float32, -bound, bound)
    w1 = jax.random.uniform(kw1, (NIN, NOUT), jnp.float32, -bound, bound)
    b1 = jax.random.uniform(kb1, (NOUT,), jnp.float32, -bound, bound)
    g0 = 1.0 + 0.1 * jax.random.normal(kg0, (NIN,), jnp.float32)
    b0 = 0.1 * jax.random.normal(kb0, (NIN,), jnp.float32)
    eps = 0.05  # GINEConv train_eps parameter

    args = (x, edge_index, edge_attr, eps, w0, g0, b0, w1, b1)
    ref_matched = _reference_matched(*args)
    ref_f32 = _reference_f32(*args)

    outs = {
        "fused_multi_tile": gine_conv_forward(*args, block_rows=16),
        "two_pass_multi_tile": gine_conv_forward(*args, block_rows=16,
                                                 force_two_pass=True),
        "auto": gine_conv_forward(*args),
    }
    for name, out in outs.items():
        out = jax.block_until_ready(out)
        assert out.shape == (N, NOUT), (name, out.shape)
        assert jnp.allclose(out, ref_matched, atol=5e-3, rtol=5e-3), \
            f"{name}: mismatch vs bf16-matched reference"
        assert jnp.allclose(out, ref_f32, atol=2e-1, rtol=2e-1), \
            f"{name}: mismatch vs f32 reference"

    print("KERNEL_OK")
</pallas_src>

<mosaic_0001>
module attributes {stable_mosaic.version = 11 : i64} {
  func.func @_fused_kernel(%arg0: i32, %arg1: i32, %arg2: memref<1x1xf32, #tpu.memory_space<smem>>, %arg3: memref<16x128xf32, #tpu.memory_space<vmem>>, %arg4: memref<16x128xf32, #tpu.memory_space<vmem>>, %arg5: memref<128x128xbf16, #tpu.memory_space<vmem>>, %arg6: memref<1x128xf32, #tpu.memory_space<vmem>>, %arg7: memref<1x128xf32, #tpu.memory_space<vmem>>, %arg8: memref<128x128xbf16, #tpu.memory_space<vmem>>, %arg9: memref<1x128xf32, #tpu.memory_space<vmem>>, %arg10: memref<16x128xf32, #tpu.memory_space<vmem>>, %arg11: memref<64x128xbf16, #tpu.memory_space<vmem>>, %arg12: memref<2x128xf32, #tpu.memory_space<vmem>>, %arg13: memref<1x128xf32, #tpu.memory_space<vmem>>, %arg14: memref<1x128xf32, #tpu.memory_space<vmem>>) attributes {dimension_semantics = [#tpu.dimension_semantics<arbitrary>, #tpu.dimension_semantics<arbitrary>], iteration_bounds = array<i64: 2, 4>, scalar_prefetch = 0 : i64, scratch_operands = 4 : i64, tpu.core_type = #tpu.core_type<tc>, window_params = [{transform_indices = @transform_0, window_bounds = array<i64: 1, 1>}, {transform_indices = @transform_1, window_bounds = array<i64: 16, 128>}, {transform_indices = @transform_2, window_bounds = array<i64: 16, 128>}, {pipeline_mode = #tpu.pipeline_mode<synchronous>, transform_indices = @transform_3, window_bounds = array<i64: 128, 128>}, {pipeline_mode = #tpu.pipeline_mode<synchronous>, transform_indices = @transform_4, window_bounds = array<i64: 1, 128>}, {pipeline_mode = #tpu.pipeline_mode<synchronous>, transform_indices = @transform_5, window_bounds = array<i64: 1, 128>}, {pipeline_mode = #tpu.pipeline_mode<synchronous>, transform_indices = @transform_6, window_bounds = array<i64: 128, 128>}, {pipeline_mode = #tpu.pipeline_mode<synchronous>, transform_indices = @transform_7, window_bounds = array<i64: 1, 128>}, {transform_indices = @transform_8, window_bounds = array<i64: 16, 128>}]} {
    %c16_i32 = arith.constant 16 : i32
    %0 = arith.muli %arg1, %c16_i32 : i32
    %1 = tpu.assume_multiple %0, 16 : i32
    %c0_i32 = arith.constant 0 : i32
    %2 = arith.cmpi eq, %arg0, %c0_i32 : i32
    %3 = arith.extui %2 : i1 to i32
    %c0_i32_0 = arith.constant 0 : i32
    %4 = arith.cmpi ne, %3, %c0_i32_0 : i32
    scf.if %4 {
      %c0_i32_2 = arith.constant 0 : i32
      %8 = arith.cmpi eq, %arg1, %c0_i32_2 : i32
      %9 = arith.extui %8 : i1 to i32
      %c0_i32_3 = arith.constant 0 : i32
      %10 = arith.cmpi ne, %9, %c0_i32_3 : i32
      scf.if %10 {
        %cst_22 = arith.constant 0.000000e+00 : f32
        %35 = vector.broadcast %cst_22 : f32 to vector<2x128xf32>
        %c0_23 = arith.constant 0 : index
        %c0_24 = arith.constant 0 : index
        %36 = vector.load %arg12[%c0_23, %c0_24] : memref<2x128xf32, #tpu.memory_space<vmem>>, vector<2x128xf32>
        tpu.vector_store %arg12[%c0_23, %c0_24], %35 {strides = array<i32>} : memref<2x128xf32, #tpu.memory_space<vmem>>, vector<2x128xf32>,
      } else {
      }
      %c0 = arith.constant 0 : index
      %c0_4 = arith.constant 0 : index
      %11 = vector.load %arg4[%c0, %c0_4] : memref<16x128xf32, #tpu.memory_space<vmem>>, vector<16x128xf32>
      %c0_5 = arith.constant 0 : index
      %c0_6 = arith.constant 0 : index
      %12 = memref.load %arg2[%c0_5, %c0_6] : memref<1x1xf32, #tpu.memory_space<smem>>
      %cst = arith.constant 1.000000e+00 : f32
      %13 = arith.addf %cst, %12 : f32
      %c0_7 = arith.constant 0 : index
      %c0_8 = arith.constant 0 : index
      %14 = vector.load %arg3[%c0_7, %c0_8] : memref<16x128xf32, #tpu.memory_space<vmem>>, vector<16x128xf32>
      %15 = vector.broadcast %13 : f32 to vector<16x128xf32>
      %16 = arith.mulf %15, %14 : vector<16x128xf32>
      %17 = arith.addf %11, %16 : vector<16x128xf32>
      %18 = arith.truncf %17 : vector<16x128xf32> to vector<16x128xbf16>
      %c0_9 = arith.constant 0 : index
      %c0_10 = arith.constant 0 : index
      %19 = vector.load %arg5[%c0_9, %c0_10] : memref<128x128xbf16, #tpu.memory_space<vmem>>, vector<128x128xbf16>
      %cst_11 = arith.constant dense<0.000000e+00> : vector<16x128xf32>
      %20 = tpu.matmul %18, %19, %cst_11 {dimension_numbers = #tpu.dot_dimension_numbers<[1], [0], [0], [1], [0, 0, 1, 1], [], []>} : vector<16x128xbf16>, vector<128x128xbf16>, vector<16x128xf32> -> vector<16x128xf32>
      %c0_12 = arith.constant 0 : index
      %c0_13 = arith.constant 0 : index
      %21 = vector.load %arg12[%c0_12, %c0_13] : memref<2x128xf32, #tpu.memory_space<vmem>>, vector<1x128xf32>
      %cst_14 = arith.constant dense<0.000000e+00> : vector<128xf32>
      %22 = vector.multi_reduction <add>, %20, %cst_14 [0] : vector<16x128xf32> to vector<128xf32>
      %23 = vector.shape_cast %22 : vector<128xf32> to vector<1x128xf32>
      %24 = arith.addf %21, %23 : vector<1x128xf32>
      %c0_15 = arith.constant 0 : index
      %c0_16 = arith.constant 0 : index
      %25 = vector.load %arg12[%c0_15, %c0_16] : memref<2x128xf32, #tpu.memory_space<vmem>>, vector<1x128xf32>
      tpu.vector_store %arg12[%c0_15, %c0_16], %24 {strides = array<i32>} : memref<2x128xf32, #tpu.memory_space<vmem>>, vector<1x128xf32>,
      %c1 = arith.constant 1 : index
      %c0_17 = arith.constant 0 : index
      %26 = vector.load %arg12[%c1, %c0_17] : memref<2x128xf32, #tpu.memory_space<vmem>>, vector<1x128xf32>
      %27 = arith.mulf %20, %20 : vector<16x128xf32>
      %cst_18 = arith.constant dense<0.000000e+00> : vector<128xf32>
      %28 = vector.multi_reduction <add>, %27, %cst_18 [0] : vector<16x128xf32> to vector<128xf32>
      %29 = vector.shape_cast %28 : vector<128xf32> to vector<1x128xf32>
      %30 = arith.addf %26, %29 : vector<1x128xf32>
      %c1_19 = arith.constant 1 : index
      %c0_20 = arith.constant 0 : index
      %31 = vector.load %arg12[%c1_19, %c0_20] : memref<2x128xf32, #tpu.memory_space<vmem>>, vector<1x128xf32>
      tpu.vector_store %arg12[%c1_19, %c0_20], %30 {strides = array<i32>} : memref<2x128xf32, #tpu.memory_space<vmem>>, vector<1x128xf32>,
      %32 = arith.truncf %20 : vector<16x128xf32> to vector<16x128xbf16>
      %33 = arith.index_cast %1 : i32 to index
      %c0_21 = arith.constant 0 : index
      %34 = vector.load %arg11[%33, %c0_21] : memref<64x128xbf16, #tpu.memory_space<vmem>>, vector<16x128xbf16>
      tpu.vector_store %arg11[%33, %c0_21], %32 {strides = array<i32>} : memref<64x128xbf16, #tpu.memory_space<vmem>>, vector<16x128xbf16>,
    } else {
    }
    %c1_i32 = arith.constant 1 : i32
    %5 = arith.cmpi eq, %arg0, %c1_i32 : i32
    %6 = arith.extui %5 : i1 to i32
    %c0_i32_1 = arith.constant 0 : i32
    %7 = arith.cmpi ne, %6, %c0_i32_1 : i32
    scf.if %7 {
      %c0_i32_2 = arith.constant 0 : i32
      %8 = arith.cmpi eq, %arg1, %c0_i32_2 : i32
      %9 = arith.extui %8 : i1 to i32
      %c0_i32_3 = arith.constant 0 : i32
      %10 = arith.cmpi ne, %9, %c0_i32_3 : i32
      scf.if %10 {
        %c0_15 = arith.constant 0 : index
        %c0_16 = arith.constant 0 : index
        %29 = vector.load %arg12[%c0_15, %c0_16] : memref<2x128xf32, #tpu.memory_space<vmem>>, vector<1x128xf32>
        %cst_17 = arith.constant 1.562500e-02 : f32
        %30 = vector.broadcast %cst_17 : f32 to vector<1x128xf32>
        %31 = arith.mulf %29, %30 : vector<1x128xf32>
        %c1 = arith.constant 1 : index
        %c0_18 = arith.constant 0 : index
        %32 = vector.load %arg12[%c1, %c0_18] : memref<2x128xf32, #tpu.memory_space<vmem>>, vector<1x128xf32>
        %cst_19 = arith.constant 1.562500e-02 : f32
        %33 = vector.broadcast %cst_19 : f32 to vector<1x128xf32>
        %34 = arith.mulf %32, %33 : vector<1x128xf32>
        %35 = arith.mulf %31, %31 : vector<1x128xf32>
        %36 = arith.subf %34, %35 : vector<1x128xf32>
        %cst_20 = arith.constant 0.000000e+00 : f32
        %37 = vector.broadcast %cst_20 : f32 to vector<1x128xf32>
        %38 = arith.maximumf %36, %37 : vector<1x128xf32>
        %c0_21 = arith.constant 0 : index
        %c0_22 = arith.constant 0 : index
        %39 = vector.load %arg6[%c0_21, %c0_22] : memref<1x128xf32, #tpu.memory_space<vmem>>, vector<1x128xf32>
        %cst_23 = arith.constant 9.99999974E-6 : f32
        %40 = vector.broadcast %cst_23 : f32 to vector<1x128xf32>
        %41 = arith.addf %38, %40 : vector<1x128xf32>
        %42 = math.rsqrt %41 : vector<1x128xf32>
        %43 = arith.mulf %39, %42 : vector<1x128xf32>
        %c0_24 = arith.constant 0 : index
        %c0_25 = arith.constant 0 : index
        %44 = vector.load %arg13[%c0_24, %c0_25] : memref<1x128xf32, #tpu.memory_space<vmem>>, vector<1x128xf32>
        tpu.vector_store %arg13[%c0_24, %c0_25], %43 {strides = array<i32>} : memref<1x128xf32, #tpu.memory_space<vmem>>, vector<1x128xf32>,
        %c0_26 = arith.constant 0 : index
        %c0_27 = arith.constant 0 : index
        %45 = vector.load %arg7[%c0_26, %c0_27] : memref<1x128xf32, #tpu.memory_space<vmem>>, vector<1x128xf32>
        %46 = arith.mulf %31, %43 : vector<1x128xf32>
        %47 = arith.subf %45, %46 : vector<1x128xf32>
        %c0_28 = arith.constant 0 : index
        %c0_29 = arith.constant 0 : index
        %48 = vector.load %arg14[%c0_28, %c0_29] : memref<1x128xf32, #tpu.memory_space<vmem>>, vector<1x128xf32>
        tpu.vector_store %arg14[%c0_28, %c0_29], %47 {strides = array<i32>} : memref<1x128xf32, #tpu.memory_space<vmem>>, vector<1x128xf32>,
      } else {
      }
      %11 = arith.index_cast %1 : i32 to index
      %c0 = arith.constant 0 : index
      %12 = vector.load %arg11[%11, %c0] : memref<64x128xbf16, #tpu.memory_space<vmem>>, vector<16x128xbf16>
      %13 = arith.extf %12 : vector<16x128xbf16> to vector<16x128xf32>
      %c0_4 = arith.constant 0 : index
      %c0_5 = arith.constant 0 : index
      %14 = vector.load %arg13[%c0_4, %c0_5] : memref<1x128xf32, #tpu.memory_space<vmem>>, vector<1x128xf32>
      %15 = vector.broadcast %14 : vector<1x128xf32> to vector<16x128xf32>
      %16 = arith.mulf %13, %15 : vector<16x128xf32>
      %c0_6 = arith.constant 0 : index
      %c0_7 = arith.constant 0 : index
      %17 = vector.load %arg14[%c0_6, %c0_7] : memref<1x128xf32, #tpu.memory_space<vmem>>, vector<1x128xf32>
      %18 = vector.broadcast %17 : vector<1x128xf32> to vector<16x128xf32>
      %19 = arith.addf %16, %18 : vector<16x128xf32>
      %cst = arith.constant 0.000000e+00 : f32
      %20 = vector.broadcast %cst : f32 to vector<16x128xf32>
      %21 = arith.maximumf %19, %20 : vector<16x128xf32>
      %22 = arith.truncf %21 : vector<16x128xf32> to vector<16x128xbf16>
      %c0_8 = arith.constant 0 : index
      %c0_9 = arith.constant 0 : index
      %23 = vector.load %arg8[%c0_8, %c0_9] : memref<128x128xbf16, #tpu.memory_space<vmem>>, vector<128x128xbf16>
      %cst_10 = arith.constant dense<0.000000e+00> : vector<16x128xf32>
      %24 = tpu.matmul %22, %23, %cst_10 {dimension_numbers = #tpu.dot_dimension_numbers<[1], [0], [0], [1], [0, 0, 1, 1], [], []>} : vector<16x128xbf16>, vector<128x128xbf16>, vector<16x128xf32> -> vector<16x128xf32>
      %c0_11 = arith.constant 0 : index
      %c0_12 = arith.constant 0 : index
      %25 = vector.load %arg9[%c0_11, %c0_12] : memref<1x128xf32, #tpu.memory_space<vmem>>, vector<1x128xf32>
      %26 = vector.broadcast %25 : vector<1x128xf32> to vector<16x128xf32>
      %27 = arith.addf %24, %26 : vector<16x128xf32>
      %c0_13 = arith.constant 0 : index
      %c0_14 = arith.constant 0 : index
      %28 = vector.load %arg10[%c0_13, %c0_14] : memref<16x128xf32, #tpu.memory_space<vmem>>, vector<16x128xf32>
      tpu.vector_store %arg10[%c0_13, %c0_14], %27 {strides = array<i32>} : memref<16x128xf32, #tpu.memory_space<vmem>>, vector<16x128xf32>,
    } else {
    }
    return
  }
  func.func @transform_0(%arg0: i32, %arg1: i32) -> (i32, i32) {
    %c0_i32 = arith.constant 0 : i32
    %c0_i32_0 = arith.constant 0 : i32
    %c0_i32_1 = arith.constant 0 : i32
    return %c0_i32, %c0_i32_0 : i32, i32
  }
  func.func @transform_1(%arg0: i32, %arg1: i32) -> (i32, i32) {
    %c1_i32 = arith.constant 1 : i32
    %0 = arith.subi %c1_i32, %arg0 : i32
    %1 = arith.muli %arg1, %0 : i32
    %c0_i32 = arith.constant 0 : i32
    %c0_i32_0 = arith.constant 0 : i32
    return %1, %c0_i32 : i32, i32
  }
  func.func @transform_2(%arg0: i32, %arg1: i32) -> (i32, i32) {
    %c1_i32 = arith.constant 1 : i32
    %0 = arith.subi %c1_i32, %arg0 : i32
    %1 = arith.muli %arg1, %0 : i32
    %c0_i32 = arith.constant 0 : i32
    %c0_i32_0 = arith.constant 0 : i32
    return %1, %c0_i32 : i32, i32
  }
  func.func @transform_3(%arg0: i32, %arg1: i32) -> (i32, i32) {
    %c0_i32 = arith.constant 0 : i32
    %c0_i32_0 = arith.constant 0 : i32
    %c0_i32_1 = arith.constant 0 : i32
    return %c0_i32, %c0_i32_0 : i32, i32
  }
  func.func @transform_4(%arg0: i32, %arg1: i32) -> (i32, i32) {
    %c0_i32 = arith.constant 0 : i32
    %c0_i32_0 = arith.constant 0 : i32
    %c0_i32_1 = arith.constant 0 : i32
    return %c0_i32, %c0_i32_0 : i32, i32
  }
  func.func @transform_5(%arg0: i32, %arg1: i32) -> (i32, i32) {
    %c0_i32 = arith.constant 0 : i32
    %c0_i32_0 = arith.constant 0 : i32
    %c0_i32_1 = arith.constant 0 : i32
    return %c0_i32, %c0_i32_0 : i32, i32
  }
  func.func @transform_6(%arg0: i32, %arg1: i32) -> (i32, i32) {
    %c0_i32 = arith.constant 0 : i32
    %c0_i32_0 = arith.constant 0 : i32
    %c0_i32_1 = arith.constant 0 : i32
    return %c0_i32, %c0_i32_0 : i32, i32
  }
  func.func @transform_7(%arg0: i32, %arg1: i32) -> (i32, i32) {
    %c0_i32 = arith.constant 0 : i32
    %c0_i32_0 = arith.constant 0 : i32
    %c0_i32_1 = arith.constant 0 : i32
    return %c0_i32, %c0_i32_0 : i32, i32
  }
  func.func @transform_8(%arg0: i32, %arg1: i32) -> (i32, i32) {
    %0 = arith.muli %arg1, %arg0 : i32
    %c0_i32 = arith.constant 0 : i32
    %c0_i32_0 = arith.constant 0 : i32
    return %0, %c0_i32 : i32, i32
  }
}

</mosaic_0001>

<bundles_post_ra>
// kernel: tpu_custom_call.1
= control target key start
LH: loop header
LB: loop body
LE: loop exit
PB: predicated region body
PF: predicated region fallthrough
CT: control target
= control target key end

     0   :  { %s1878_s0 = inlined_call_operand.<no memory space> [shape: f32[1,1], index: 0, kind: input, shape index: {}]   ;;  %s1879_s1 = inlined_call_operand.hbm [shape: f32[64,128], index: 1, kind: input, shape index: {}]   ;;  %s1880_s2 = inlined_call_operand.hbm [shape: f32[64,128], index: 2, kind: input, shape index: {}]   ;;  %s1881_s3 = inlined_call_operand.hbm [shape: bf16[128,128], index: 3, kind: input, shape index: {}]   ;;  %s1882_s4 = inlined_call_operand.vmem [shape: f32[1,128], index: 4, kind: input, shape index: {}]   ;;  %s1883_s5 = inlined_call_operand.vmem [shape: f32[1,128], index: 5, kind: input, shape index: {}]   ;;  %s1884_s6 = inlined_call_operand.hbm [shape: bf16[128,128], index: 6, kind: input, shape index: {}]   ;;  %s1885_s7 = inlined_call_operand.vmem [shape: f32[1,128], index: 7, kind: input, shape index: {}]   ;;  %s1886_s8 = inlined_call_operand.hbm [shape: f32[64,128], index: 8, kind: output, shape index: {}]  }
   0x1   :  { %1898 = sst [smem:[#allocation27_spill]] %s1879_s1 }
   0x2   :  { %1899 = sst [smem:[#allocation28_spill]] %s1881_s3 }
   0x3   :  { %1900 = sst [smem:[#allocation29_spill]] %s1882_s4 }
   0x4   :  { %1901 = sst [smem:[#allocation30_spill]] %s1883_s5 }
   0x5   :  { %1902 = sst [smem:[#allocation31_spill]] %s1884_s6 }
   0x6   :  { %1903 = sst [smem:[#allocation32_spill]] %s1885_s7 }
   0x7   :  { %1904 = sst [smem:[#allocation33_spill]] %s1886_s8 }
   0x8   :  { %13 = sst [smem:[#allocation6]] %s1878_s0 }
   0x9   :  { %14 = vsyncpa [#allocation8], 0 }
   0xa   :  { %16 = vsyncpa [#allocation8 + $0x1], 0 }
   0xb   :  { %17 = vsyncpa [#allocation11], 0 }
   0xc   :  { %19 = vsyncpa [#allocation11 + $0x1], 0 }
   0xd   :  { %20 = vsyncpa [#allocation14], 0 }
   0xe   :  { %21 = vsyncpa [#allocation9], 0 }
   0xf   :  { %23 = vsyncpa [#allocation9 + $0x1], 0  ;;  %s1478_s29 = smov 0   ;;  %s1480_s30 = smov 0  }
  0x10   :  { %s1482_s9 = smov 0   ;;  %s1484_s10 = smov 0  }
  0x11   :  { %s1486_s11 = smov 0   ;;  %s1488_s12 = smov 0  }
  0x12   :  { %s1490_s0 = smov 0   ;;  %s1492_s13 = smov 0  }
  0x13   :  { %s1494_s14 = smov 0   ;;  %s1496_s15 = smov 0  }
  0x14   :  { %s1498_s16 = smov 0  }
  0x15 LB: > { %1905 = sst [smem:[#allocation21_spill]] %s1372_s29  ;;  %s1532_s17 = sadd.s32 4294967295, %s1412_s16   ;;  %s1412_s16 = sphi %s1498_s16, %s29_s16   ;;  %s1408_s15 = sphi %s1496_s15, %s1950_s15   ;;  %s1404_s14 = sphi %s1494_s14, %s1949_s14   ;;  %s1400_s13 = sphi %s1492_s13, %s1942_s13   ;;  %s1396_s0 = sphi %s1490_s0, %s1941_s0   ;;  %s1392_s12 = sphi %s1488_s12, %s1948_s12   ;;  %s1388_s11 = sphi %s1486_s11, %s1947_s11   ;;  %s1384_s10 = sphi %s1484_s10, %s1946_s10   ;;  %s1380_s9 = sphi %s1482_s9, %s1945_s9   ;;  %s1376_s30 = sphi %s1480_s30, %s1944_s30   ;;  %s1372_s29 = sphi %s1478_s29, %s1943_s29  }
  0x16   : > { %1906 = sst [smem:[#allocation22_spill]] %s1400_s13  ;;  %s896_s18 = sadd.s32 4294967294, %s1412_s16  }
  0x17   : > { %1907 = sst [smem:[#allocation23_spill]] %s1404_s14  ;;  %p86_p0 = scmp.ne.s32.totalorder %s1388_s11, %s1384_s10 }
  0x18   : > { %1908 = sst [smem:[#allocation24_spill]] %s1408_s15  ;;  %p1890_p1 = scmp.eq.s32.totalorder %s1532_s17, 0 }
  0x19   : > { %p246_p2 = scmp.ne.s32.totalorder %s1380_s9, %s1376_s30  ;;  %p247_p4 = scmp.eq.s32.totalorder %s1532_s17, 7 }
  0x1a   : > { %p1542_p3 = por %p1890_p1, %p86_p0  ;;  %p252_p5 = scmp.ne.s32.totalorder %s1376_s30, %s1372_s29 }
  0x1b   : > { %p253_p6 = scmp.eq.s32.totalorder %s896_s18, 7  ;;  %p1549_p7 = por %p247_p4, %p246_p2 }
  0x1c   : > { %s1909_s20 = scalar_select %p1542_p3, 1, 0 }
  0x1d   : > { %s1910_s21 = scalar_select %p1549_p7, 1, 0 }
  0x1e   : > { %p897_p8 = scmp.ge.s32.totalorder %s1412_s16, 1  ;;  %p1554_p9 = por %p253_p6, %p252_p5 }
  0x1f   : > { %1911 = sst [smem:[#allocation25_spill]] %s1910_s21  ;;  %p260_p10 = scmp.lt.s32.totalorder %s1412_s16, 9 }
  0x20   : > { %s1912_s22 = scalar_select %p1554_p9, 1, 0 }
  0x21   : > { %p1559_p11 = pnand %p897_p8, %p260_p10  ;;  %s1414_s24 = smov [#allocation12]  }
  0x22   : > { %1913 = sst [smem:[#allocation26_spill]] %s1912_s22  ;;  %s275_s25 = sshll.u32 %s1414_s24, 4  ;;  %s276_s25 = int_to_ptr.vmem [resolvable:$true] %s275_s25 }
  0x23   : > { %s1914_s23 = scalar_select %p1559_p11, 1, 0 }
  0x24   : > { %p1019_p12 = pneg %p1559_p11  ;;  %s1415_s27 = smov [#allocation13]  }
  0x25   : > { %s294_s28 = sshll.u32 %s1415_s27, 4  ;;  %s1916_s3 = sld [smem:[#allocation28_spill]]  ;;  %s1571_s28 = int_to_ptr.vmem [resolvable:$true] %s294_s28 }
  0x26   : > { %p1567_p13 = pnand %p1019_p12, %p1890_p1 }
  0x28   : > { %p1164_p2 = pneg %p1567_p13 }
  0x2b   : > { %s1162_s19 = scalar_lea.hbm %s1916_s3, 1024 }
  0x2c   : > { %p1163_p0 = scmp.ne.s32.totalorder %s1916_s3, %s1162_s19  ;;  %p1169_p6 = scmp.lt.u32.totalorder %s1162_s19, %s1916_s3 }
  0x2e   : > { %p1165_p4 = pnand %p1164_p2, %p1163_p0 }
  0x30   : > { %p1166_p5 = pneg %p1165_p4 }
  0x32   : > { %p1171_p8 = pnand %p1169_p6, %p1166_p5 }
  0x34   : > { %1174 = shalt.err (!%p1171_p8)
}
  0x35   : > { %s1175_s27 = scalar_lea.vmem %s276_s25, 1024  ;;  %p1183_p9 = scmp.lt.s32.totalorder %s276_s25, %s276_s25 }
  0x36   : > { %p1176_p10 = scmp.ne.s32.totalorder %s276_s25, %s1175_s27  ;;  %p1184_p7 = scmp.lt.s32.totalorder %s1175_s27, %s1175_s27 }
  0x38   : > { %p1178_p12 = pnand %p1176_p10, %p1164_p2  ;;  %p1185_p3 = por %p1184_p7, %p1183_p9 }
  0x3a   : > { %p1179_p1 = pneg %p1178_p12 }
  0x3c   : > { %p1186_p11 = pnand %p1185_p3, %p1179_p1 }
  0x3e   : > { %1189 = shalt.err (!%p1186_p11)
}
  0x3f   : > { %s1416_s22 = smov 64   ;;  %s1417_s10 = smov 4  }
  0x40   : > { %1022 = dma.hbm_to_vmem [thread:$0]  (!%p1567_p13), %s1916_s3, 1024, %s276_s25, [#allocation11], %s1416_s22, %s1416_s22, %s1417_s10  }
  0x41   : > { %s1917_s6 = sld [smem:[#allocation31_spill]] }
  0x47   : > { %s1190_s24 = scalar_lea.hbm %s1917_s6, 1024 }
  0x48   : > { %p1191_p0 = scmp.ne.s32.totalorder %s1917_s6, %s1190_s24  ;;  %p1197_p7 = scmp.lt.u32.totalorder %s1190_s24, %s1917_s6 }
  0x4a   : > { %p1193_p1 = pnand %p1191_p0, %p1164_p2 }
  0x4c   : > { %p1194_p3 = pneg %p1193_p1 }
  0x4e   : > { %p1199_p9 = pnand %p1197_p7, %p1194_p3 }
  0x50   : > { %1202 = shalt.err (!%p1199_p9)
}
  0x51   : > { %s1203_s25 = scalar_lea.vmem %s1571_s28, 1024  ;;  %p1211_p6 = scmp.lt.s32.totalorder %s1571_s28, %s1571_s28 }
  0x52   : > { %p1204_p11 = scmp.ne.s32.totalorder %s1571_s28, %s1203_s25  ;;  %p1212_p8 = scmp.lt.s32.totalorder %s1203_s25, %s1203_s25 }
  0x54   : > { %p1206_p4 = pnand %p1204_p11, %p1164_p2  ;;  %p1213_p10 = por %p1212_p8, %p1211_p6 }
  0x56   : > { %p1207_p5 = pneg %p1206_p4 }
  0x58   : > { %p1214_p12 = pnand %p1213_p10, %p1207_p5 }
  0x5a   : > { %1217 = shalt.err (!%p1214_p12)
}
  0x5b   : > { %1025 = dma.hbm_to_vmem [thread:$0]  (!%p1567_p13), %s1917_s6, 1024, %s1571_s28, [#allocation14], %s1416_s22, %s1416_s22, %s1417_s10  }
  0x5c   : > { %s38_s21 = sadd.s32 1, %s1404_s14  ;;  %s41_s26 = sadd.s32 1, %s1408_s15 }
  0x5d   : > { %p39_p2 = scmp.ge.s32.totalorder %s38_s21, 4  ;;  %s66_s8 = ssub.s32 1, %s1408_s15 }
  0x5e   : > { %s1624_s29 = smul.u32 %s1404_s14, %s66_s8  ;;  %s73_s19 = sadd.s32 1, %s1392_s12 }
  0x5f   : > { %s1952_s21 = smov (%p39_p2, %s38_s21), 0  ;;  %s1954_s26 = smov (!%p39_p2, %s41_s26), %s1408_s15 }
  0x60   : > { %p80_p0 = scmp.ne.s32.totalorder %s1392_s12, %s1388_s11  ;;  %p81_p1 = scmp.eq.s32.totalorder %s1412_s16, 0 }
  0x61   : > { %p43_p13 = scmp.ge.s32.totalorder %s1954_s26, 2  ;;  %s231_s28 = smul.u32 %s1404_s14, %s1408_s15 }
  0x62   : > { %p1635_p3 = por %p81_p1, %p80_p0  ;;  %p1039_p7 = scmp.lt.s32.totalorder %s1412_s16, 8 }
  0x63   : > { %s1956_s26 = smov (%p43_p13, %s1954_s26), 0  ;;  %s311_s10 = sand.u32 1, %s1392_s12  }
  0x64   : > { %s944_s18 = sshll.u32 %s1624_s29, 8  ;;  %s68_s24 = ssub.s32 1, %s1956_s26 }
  0x65   : > { %s232_s27 = smul.u32 %s1956_s26, %s1952_s21  ;;  %s1648_s7 = sshll.u32 %s311_s10, 4 }
  0x66   : > { %s69_s25 = smul.u32 %s68_s24, %s1952_s21  ;;  %s1919_s3 = sadd.s32 1, %s1380_s9 }
  0x67   : > { %s233_s5 = ssub.s32 %s231_s28, %s232_s27  ;;  %s1920_s1 = sld [smem:[#allocation27_spill]] }
  0x68   : > { %s70_s8 = ssub.s32 %s1624_s29, %s69_s25  ;;  %p234_p9 = scmp.eq.s32.totalorder %s233_s5, 0 }
  0x69   : > { %p71_p11 = scmp.eq.s32.totalorder %s70_s8, 0  ;;  %s315_s28 = scalar_lea.vmem [#allocation7], %s1648_s7 }
  0x6a   : > { %s1654_s6 = scalar_select %p234_p9, %s1380_s9, %s1919_s3  }
  0x6b   : > { %s1657_s15 = scalar_select %p71_p11, %s1392_s12, %s73_s19  }
  0x6c   : > { %s324_s24 = sshll.u32 %s315_s28, 4  ;;  %p1673_p4 = pnand %p1039_p7, %p1635_p3  ;;  %s1667_s24 = int_to_ptr.vmem [resolvable:$true] %s324_s24 }
  0x6d   : > { %s1664_s13 = scalar_lea.hbm %s1920_s1, %s944_s18  ;;  %s1677_s19 = scalar_lea.sflag [#allocation8], %s311_s10 }
  0x6e   : > { %s1218_s4 = scalar_lea.hbm %s1664_s13, 256  ;;  %p1220_p6 = pneg %p1673_p4 }
  0x6f   : > { %p1219_p5 = scmp.ne.s32.totalorder %s1664_s13, %s1218_s4  ;;  %s1223_s22 = scalar_lea.hbm %s1920_s1, 1024 }
  0x70   : > { %p1224_p12 = scmp.lt.u32.totalorder %s1664_s13, %s1920_s1  ;;  %p1225_p2 = scmp.lt.u32.totalorder %s1223_s22, %s1218_s4 }
  0x71   : > { %p1221_p8 = pnand %p1220_p6, %p1219_p5  ;;  %p1227_p1 = scmp.lt.u32.totalorder %s1218_s4, %s1664_s13 }
  0x72   : > { %p1226_p0 = por %p1225_p2, %p1224_p12 }
  0x73   : > { %p1222_p10 = pneg %p1221_p8 }
  0x74   : > { %p1228_p13 = por %p1227_p1, %p1226_p0 }
  0x76   : > { %p1229_p3 = pnand %p1228_p13, %p1222_p10 }
  0x78   : > { %1232 = shalt.err (!%p1229_p3)
}
  0x79   : > { %s1233_s10 = scalar_lea.vmem %s1667_s24, 256  ;;  %s1418_s8 = smov [#allocation7]  }
  0x7a   : > { %p1234_p7 = scmp.ne.s32.totalorder %s1667_s24, %s1233_s10  ;;  %s1238_s28 = sshll.u32 %s1418_s8, 4  ;;  %s1239_s28 = int_to_ptr.vmem [resolvable:$false] %s1238_s28 }
  0x7b   : > { %s1240_s14 = scalar_lea.vmem %s1239_s28, 512  ;;  %p1241_p5 = scmp.lt.s32.totalorder %s1667_s24, %s1239_s28 }
  0x7c   : > { %p1236_p9 = pnand %p1234_p7, %p1220_p6  ;;  %p1242_p8 = scmp.lt.s32.totalorder %s1240_s14, %s1233_s10 }
  0x7e   : > { %p1237_p11 = pneg %p1236_p9  ;;  %p1243_p12 = por %p1242_p8, %p1241_p5 }
  0x80   : > { %p1244_p2 = pnand %p1243_p12, %p1237_p11 }
  0x82   : > { %1247 = shalt.err (!%p1244_p2)
}
  0x83   : > { %s1419_s4 = smov 128   ;;  %s1420_s27 = smov 8  }
  0x84   : > { %1029 = dma.hbm_to_vmem [thread:$0]  (!%p1673_p4), %s1664_s13, 256, %s1667_s24, %s1677_s19, %s1419_s4, %s1419_s4, %s1420_s27  }
  0x85   : > { %s1713_s5 = scalar_lea.hbm %s1880_s2, %s944_s18  ;;  %s338_s10 = scalar_lea.vmem [#allocation10], %s1648_s7 }
  0x86   : > { %s347_s8 = sshll.u32 %s338_s10, 4  ;;  %s334_s28 = sand.u32 1, %s1412_s16   ;;  %s1716_s8 = int_to_ptr.vmem [resolvable:$true] %s347_s8 }
  0x87   : > { %s1719_s14 = scalar_lea.sflag [#allocation11], %s334_s28  ;;  %s1248_s1 = scalar_lea.hbm %s1713_s5, 256 }
  0x88   : > { %p1249_p10 = scmp.ne.s32.totalorder %s1713_s5, %s1248_s1  ;;  %s1253_s18 = scalar_lea.hbm %s1880_s2, 1024 }
  0x89   : > { %p1254_p13 = scmp.lt.u32.totalorder %s1713_s5, %s1880_s2  ;;  %p1255_p3 = scmp.lt.u32.totalorder %s1253_s18, %s1248_s1 }
  0x8a   : > { %p1251_p0 = pnand %p1249_p10, %p1220_p6  ;;  %p1257_p9 = scmp.lt.u32.totalorder %s1248_s1, %s1713_s5 }
  0x8b   : > { %p1256_p7 = por %p1255_p3, %p1254_p13 }
  0x8c   : > { %p1252_p1 = pneg %p1251_p0 }
  0x8d   : > { %p1258_p11 = por %p1257_p9, %p1256_p7 }
  0x8f   : > { %p1259_p5 = pnand %p1258_p11, %p1252_p1 }
  0x91   : > { %1262 = shalt.err (!%p1259_p5)
}
  0x92   : > { %s1263_s7 = scalar_lea.vmem %s1716_s8, 256  ;;  %s1421_s22 = smov [#allocation10]  }
  0x93   : > { %p1264_p8 = scmp.ne.s32.totalorder %s1716_s8, %s1263_s7  ;;  %s1268_s25 = sshll.u32 %s1421_s22, 4  ;;  %s1269_s25 = int_to_ptr.vmem [resolvable:$false] %s1268_s25 }
  0x94   : > { %s1270_s10 = scalar_lea.vmem %s1269_s25, 512  ;;  %p1271_p10 = scmp.lt.s32.totalorder %s1716_s8, %s1269_s25 }
  0x95   : > { %p1266_p12 = pnand %p1264_p8, %p1220_p6  ;;  %p1272_p0 = scmp.lt.s32.totalorder %s1270_s10, %s1263_s7 }
  0x97   : > { %p1267_p2 = pneg %p1266_p12  ;;  %p1273_p13 = por %p1272_p0, %p1271_p10 }
  0x99   : > { %p1274_p3 = pnand %p1273_p13, %p1267_p2 }
  0x9b   : > { %1277 = shalt.err (!%p1274_p3)
}
  0x9c   : > { %1032 = dma.hbm_to_vmem [thread:$0]  (!%p1673_p4), %s1713_s5, 256, %s1716_s8, %s1719_s14, %s1419_s4, %s1419_s4, %s1420_s27  }
  0x9d   : > { %p1922_p6 = scmp.ne.s32.totalorder %s1914_s23, 0 }
  0x9e   : > { %s361_s1 = sand.u32 (!%p1922_p6), 1, %s1388_s11   ;;  %p1923_p1 = scmp.ne.s32.totalorder (!%p1922_p6), %s1909_s20, 0 }
  0x9f   : > { %359 = sbr.rel (%p1922_p6) target bundleno = 790 (0x316), region = 52  ;;  %s1751_s28 = sshll.u32 (!%p1922_p6), %s361_s1, 4 }
  0xa0   : > { %s362_s13 = scalar_lea.sflag (!%p1922_p6), [#allocation8], %s361_s1  ;;  %s365_s29 = scalar_lea.vmem (!%p1922_p6), [#allocation7], %s1751_s28 }
  0xa6   : > { %1351 = dma.done.wait (%p1923_p1), %s362_s13, 256  }
  0xa7   : > { %1353 = vsyncadd (%p1923_p1), %s362_s13, 4294967040  ;;  %s370_s3 = sand.u32 1, %s1532_s17   ;;  %s374_s23 = scalar_lea.vmem [#allocation10], %s1751_s28 }
  0xa8   : > { %s371_s4 = scalar_lea.sflag [#allocation11], %s370_s3 }
  0xa9   : > { %1355 = dma.done.wait (%p1923_p1), %s371_s4, 256  }
  0xaa   : > { %1357 = vsyncadd (%p1923_p1), %s371_s4, 4294967040  ;;  %p1924_p4 = scmp.eq.s32.totalorder %s1532_s17, 0 }
  0xac   : > { %1359 = dma.done.wait (%p1924_p4), [#allocation11], 1024   ;;  %p1925_p7 = pmov %p1924_p4 }
  0xad   : > { %p1926_p9 = pmov %p1924_p4 }
  0xae   : > { %1361 = vsyncadd (%p1925_p7), [#allocation11], 4294966272 }
  0xaf   : > { %1363 = dma.done.wait (%p1926_p9), [#allocation14], 1024   ;;  %p1927_p11 = pmov %p1924_p4 }
  0xb0   : > { %s417_s27 = sand.u32 1, %s1376_s30   ;;  %s913_s5 = sshll.u32 %s1396_s0, 4 }
  0xb1   : > { %1365 = vsyncadd (%p1927_p11), [#allocation14], 4294966272  ;;  %s912_s20 = sshll.u32 %s417_s27, 4  ;;  %s1928_s14 = sld [smem:[#allocation22_spill]] }
  0xb2   : > { %s1776_s8 = scalar_lea.vmem [#allocation15], %s912_s20 }
  0xb7   : > { %p914_p5 = scmp.ne.s32.totalorder %s1928_s14, 0 }
  0xb8   : > { %p915_p8 = scmp.ne.s32.totalorder (!%p914_p5), %s1396_s0, 0 }
  0xb9   : > { %433 = sbr.rel (%p914_p5) target bundleno = 465 (0x1d1), region = 72 }
  0xc0   : > { %437 = sbr.rel (%p915_p8) target bundleno = 199 (0xc7), region = 76  ;;  %v1422_v0 = vmov (!%p915_p8), 0.0  }
  0xc1   : > { %438 = vst [vmem:[#allocation3] sm:$0x3] (!%p915_p8), %v1422_v0 }
  0xc7 PF: > { %v1144_v1 = vld [vmem:[#allocation12] sm:$0xff]   ;;  %v1423_v2 = vmov 0.0   ;;  %v1145_v3 = vld [vmem:[#allocation12 + $0x8] sm:$0xff]   ;;  %vm1424_vm0 = vmmov 0   ;;  %v1146_v4 = vld [vmem:[#allocation12 + $0x10] sm:$0xff]   ;;  %s441_s17 = sld [smem:[#allocation6]] }
  0xc8   : > { %965 = vmatprep.subr.bf16.mxu0 %v1423_v2  ;;  %981 = vmatprep.mubr.msk.bf16.mxu0 %vm1424_vm0, %v1423_v2  ;;  %v1147_v5 = vld [vmem:[#allocation12 + $0x18] sm:$0xff]   ;;  %v1148_v6 = vld [vmem:[#allocation12 + $0x20] sm:$0xff]   ;;  %v1149_v7 = vld [vmem:[#allocation12 + $0x28] sm:$0xff]   ;;  %s579_s24 = sshra.s32 %s913_s5, 4 }
  0xc9   : > { %966 = vmatpush3.bf16.msra.mxu0 %v1144_v1  ;;  %v443_v8 = vld [vmem:[%s365_s29] sm:$0xff]  ;;  %v444_v9 = vld [vmem:[%s365_s29 + $0x8] sm:$0xff]  ;;  %s924_s19 = sshll.u32 %s579_s24, 3 }
  0xca   : > { %967 = vmatprep.subr.bf16.mxu0 %v1423_v2  ;;  %v1150_v13 = vld [vmem:[#allocation12 + $0x30] sm:$0xff]   ;;  %v440_v15 = vld [vmem:[%s374_s23 + $0x8] sm:$0xff]  ;;  %s582_s7 = scalar_lea.vmem [#allocation2], %s924_s19 }
  0xcb   : > { %v439_v14 = vld [vmem:[%s374_s23] sm:$0xff]  ;;  %v1151_v18 = vld [vmem:[#allocation12 + $0x38] sm:$0xff]  }
  0xcc   : > { %v556_v38 = vld [vmem:[#allocation3] sm:$0x1]  ;;  %v566_v41 = vld [vmem:[#allocation3 + $0x1] sm:$0x1] }
  0xcd   : > { %968 = vmatpush3.bf16.msra.mxu0 %v1145_v3  ;;  %s442_s18 = sadd.f32 1.0, %s441_s17 }
  0xce   : > { %969 = vmatprep.subr.bf16.mxu0 %v1423_v2 }
  0xcf   : > { %v445_v10 = vstv %s442_s18 }
  0xd0   : > { %v446_v11 = vmul.f32 %v445_v10, %v443_v8  ;;  %v447_v12 = vmul.f32 %v445_v10, %v444_v9 }
  0xd1   : > { %970 = vmatpush3.bf16.msra.mxu0 %v1146_v4 }
  0xd2   : > { %971 = vmatprep.subr.bf16.mxu0 %v1423_v2  ;;  %v448_v16 = vadd.f32 %v446_v11, %v439_v14  ;;  %v449_v17 = vadd.f32 %v447_v12, %v440_v15 }
  0xd4   : > { %v450_v19 = vpack.c.bf16 %v449_v17, %v448_v16 }
  0xd5   : > { %972 = vmatpush3.bf16.msra.mxu0 %v1147_v5 }
  0xd6   : > { %973 = vmatprep.subr.bf16.mxu0 %v1423_v2 }
  0xd9   : > { %974 = vmatpush3.bf16.msra.mxu0 %v1148_v6 }
  0xda   : > { %975 = vmatprep.subr.bf16.mxu0 %v1423_v2 }
  0xdd   : > { %976 = vmatpush3.bf16.msra.mxu0 %v1149_v7 }
  0xde   : > { %977 = vmatprep.subr.bf16.mxu0 %v1423_v2 }
  0xe1   : > { %978 = vmatpush3.bf16.msra.mxu0 %v1150_v13 }
  0xe2   : > { %979 = vmatprep.subr.bf16.mxu0 %v1423_v2 }
  0xe5   : > { %980 = vmatpush3.bf16.msra.mxu0 %v1151_v18 }
  0xe8   : > { %982 = vmatmul.mubr.bf16.vlgmr.msra.gmra.mrb[0].mxu0 %v450_v19 }
 0x1bb   : > { %v549_v20 = vpop.f32.mrb[0].mxu0 }
 0x1bc   : > { %v983_v21 = vpop.f32.mrb[1].mxu0  ;;  %v567_v23 = vmul.f32 %v549_v20, %v549_v20 }
 0x1bd   : > { %v552_v22 = vpop.f32.mrb[2].mxu0 }
 0x1be   : > { %v557_v24 = vadd.f32 %v552_v22, %v549_v20  ;;  %v568_v25 = vmul.f32 %v552_v22, %v552_v22  ;;  %v578_v26 = vpack.c.bf16 %v552_v22, %v549_v20  ;;  %v984_v27 = vpop.f32.mrb[3].mxu0 }
 0x1c0   : > { %v558_v28 = vrot.slane %v557_v24, 4  ;;  %v569_v29 = vadd.f32 %v568_v25, %v567_v23  ;;  %583 = vst [vmem:[%s582_s7] sm:$0xff] %v578_v26 }
 0x1c2   : > { %v559_v30 = vadd.f32 %v558_v28, %v557_v24  ;;  %v570_v31 = vrot.slane %v569_v29, 4 }
 0x1c4   : > { %v560_v32 = vrot.slane %v559_v30, 2  ;;  %v571_v33 = vadd.f32 %v570_v31, %v569_v29 }
 0x1c6   : > { %v561_v34 = vadd.f32 %v560_v32, %v559_v30  ;;  %v572_v35 = vrot.slane %v571_v33, 2 }
 0x1c8   : > { %v562_v36 = vrot.slane %v561_v34, 1  ;;  %v573_v37 = vadd.f32 %v572_v35, %v571_v33 }
 0x1ca   : > { %v563_v39 = vadd.f32 %v562_v36, %v561_v34  ;;  %v574_v40 = vrot.slane %v573_v37, 1 }
 0x1cc   : > { %v564_v42 = vadd.f32 %v563_v39, %v556_v38  ;;  %v575_v43 = vadd.f32 %v574_v40, %v573_v37 }
 0x1ce   : > { %565 = vst [vmem:[#allocation3] sm:$0x1] %v564_v42  ;;  %v576_v44 = vadd.f32 %v575_v43, %v566_v41 }
 0x1d0   : > { %577 = vst [vmem:[#allocation3 + $0x1] sm:$0x1] %v576_v44 }
 0x1d1 PF: > { %s1929_s22 = sld [smem:[#allocation22_spill]] }
 0x1d7   : > { %p925_p12 = scmp.ne.s32.totalorder %s1929_s22, 1 }
 0x1d8   : > { %p926_p2 = scmp.ne.s32.totalorder (!%p925_p12), %s1396_s0, 0 }
 0x1d9   : > { %587 = sbr.rel (%p925_p12) target bundleno = 759 (0x2f7), region = 80 }
 0x1e0   : > { %591 = sbr.rel (%p926_p2) target bundleno = 509 (0x1fd), region = 84  ;;  %v592_v45 = vld [vmem:[#allocation3] sm:$0x1] (!%p926_p2)  ;;  %v594_v46 = vld [vmem:[#allocation3 + $0x1] sm:$0x1] (!%p926_p2)  ;;  %s1930_s1 = sld [smem:[#allocation29_spill]] (!%p926_p2) }
 0x1e1   : > { %v593_v47 = vmul.f32 (!%p926_p2), 0.015625, %v592_v45  ;;  %v595_v48 = vmul.f32 (!%p926_p2), 0.015625, %v594_v46  ;;  %s1931_s29 = sld [smem:[#allocation30_spill]] (!%p926_p2) }
 0x1e3   : > { %v596_v49 = vmul.f32 (!%p926_p2), %v593_v47, %v593_v47 }
 0x1e5   : > { %v597_v50 = vsub.f32 (!%p926_p2), %v595_v48, %v596_v49 }
 0x1e6   : > { %v599_v53 = vld [vmem:[%s1930_s1] sm:$0x1] (!%p926_p2) }
 0x1e7   : > { %v598_v51 = vmax.f32 %v597_v50, 0.0  ;;  %v604_v56 = vld [vmem:[%s1931_s29] sm:$0x1] }
 0x1e9   : > { %v600_v52 = vadd.f32 1e-05, %v598_v51 }
 0x1eb   : > { %1152 = vrsqrt.f32 %v600_v52 }
 0x1f5   : > { %v1153_v54 = vpop.eup %1152 }
 0x1f6   : > { %v602_v55 = vmul.f32 %v1153_v54, %v599_v53 }
 0x1f8   : > { %603 = vst [vmem:[#allocation4] sm:$0x1] %v602_v55  ;;  %v605_v57 = vmul.f32 %v602_v55, %v593_v47 }
 0x1fa   : > { %v606_v58 = vsub.f32 %v604_v56, %v605_v57 }
 0x1fc   : > { %607 = vst [vmem:[#allocation5] sm:$0x1] %v606_v58 }
 0x1fd PF: > { %v1154_v59 = vld [vmem:[#allocation13] sm:$0xff]   ;;  %v1425_v60 = vmov 0.0   ;;  %v1155_v61 = vld [vmem:[#allocation13 + $0x8] sm:$0xff]   ;;  %vm1426_vm1 = vmmov 0   ;;  %s608_s3 = sshra.s32 %s913_s5, 4  ;;  %v1156_v62 = vld [vmem:[#allocation13 + $0x10] sm:$0xff]  }
 0x1fe   : > { %985 = vmatprep.subr.bf16.mxu0 %v1425_v60  ;;  %1001 = vmatprep.mubr.msk.bf16.mxu0 %vm1426_vm1, %v1425_v60  ;;  %s927_s4 = sshll.u32 %s608_s3, 3  ;;  %v1157_v63 = vld [vmem:[#allocation13 + $0x18] sm:$0xff]   ;;  %v1158_v3 = vld [vmem:[#allocation13 + $0x20] sm:$0xff]   ;;  %v1159_v7 = vld [vmem:[#allocation13 + $0x28] sm:$0xff]   ;;  %s1932_s14 = sld [smem:[#allocation32_spill]] }
 0x1ff   : > { %986 = vmatpush3.bf16.msra.mxu0 %v1154_v59  ;;  %s611_s23 = scalar_lea.vmem [#allocation2], %s927_s4  ;;  %v928_v4 = vld [vmem:[#allocation4] ss:$0 sm:$0xff]  ;;  %v1160_v11 = vld [vmem:[#allocation13 + $0x30] sm:$0xff]  }
 0x200   : > { %987 = vmatprep.subr.bf16.mxu0 %v1425_v60  ;;  %v612_v0 = vld [vmem:[%s611_s23] sm:$0xff] }
 0x201   : > { %v613_v1 = vunpack.c.l.bf16 %v612_v0  ;;  %v614_v2 = vunpack.c.h.bf16 %v612_v0  ;;  %v1161_v14 = vld [vmem:[#allocation13 + $0x38] sm:$0xff]  }
 0x203   : > { %988 = vmatpush3.bf16.msra.mxu0 %v1155_v61  ;;  %v622_v5 = vmul.f32 %v928_v4, %v613_v1  ;;  %v623_v6 = vmul.f32 %v928_v4, %v614_v2  ;;  %v929_v8 = vld [vmem:[#allocation5] ss:$0 sm:$0xff] }
 0x204   : > { %989 = vmatprep.subr.bf16.mxu0 %v1425_v60  ;;  %v930_v16 = vld [vmem:[%s1932_s14] ss:$0 sm:$0xff] }
 0x205   : > { %v631_v9 = vadd.f32 %v929_v8, %v622_v5  ;;  %v632_v10 = vadd.f32 %v929_v8, %v623_v6 }
 0x207   : > { %990 = vmatpush3.bf16.msra.mxu0 %v1156_v62  ;;  %v633_v12 = vmax.f32 %v631_v9, 0.0  ;;  %v634_v13 = vmax.f32 %v632_v10, 0.0 }
 0x208   : > { %991 = vmatprep.subr.bf16.mxu0 %v1425_v60 }
 0x209   : > { %v635_v15 = vpack.c.bf16 %v634_v13, %v633_v12 }
 0x20b   : > { %992 = vmatpush3.bf16.msra.mxu0 %v1157_v63 }
 0x20c   : > { %993 = vmatprep.subr.bf16.mxu0 %v1425_v60 }
 0x20f   : > { %994 = vmatpush3.bf16.msra.mxu0 %v1158_v3 }
 0x210   : > { %995 = vmatprep.subr.bf16.mxu0 %v1425_v60 }
 0x213   : > { %996 = vmatpush3.bf16.msra.mxu0 %v1159_v7 }
 0x214   : > { %997 = vmatprep.subr.bf16.mxu0 %v1425_v60 }
 0x217   : > { %998 = vmatpush3.bf16.msra.mxu0 %v1160_v11 }
 0x218   : > { %999 = vmatprep.subr.bf16.mxu0 %v1425_v60 }
 0x21b   : > { %1000 = vmatpush3.bf16.msra.mxu0 %v1161_v14 }
 0x21e   : > { %1002 = vmatmul.mubr.bf16.vlgmr.msra.gmra.mrb[0].mxu0 %v635_v15 }
 0x2f1   : > { %v741_v17 = vpop.f32.mrb[0].mxu0 }
 0x2f2   : > { %v742_v18 = vadd.f32 %v930_v16, %v741_v17  ;;  %v1003_v19 = vpop.f32.mrb[1].mxu0 }
 0x2f3   : > { %v744_v20 = vpop.f32.mrb[2].mxu0 }
 0x2f4   : > { %748 = vst [vmem:[%s1776_s8] sm:$0xff] %v742_v18  ;;  %v745_v21 = vadd.f32 %v930_v16, %v744_v20  ;;  %v1004_v22 = vpop.f32.mrb[3].mxu0 }
 0x2f6   : > { %749 = vst [vmem:[%s1776_s8 + $0x8] sm:$0xff] %v745_v21 }
 0x2f7 PF: > { %s1933_s17 = sld [smem:[#allocation22_spill]]  ;;  %s1934_s18 = sld [smem:[#allocation25_spill]] }
 0x2f8   : > { %s765_s19 = sshll.u32 %s1776_s8, 4  ;;  %s1935_s10 = sld [smem:[#allocation33_spill]]  ;;  %s1808_s19 = int_to_ptr.vmem [resolvable:$true] %s765_s19 }
 0x2f9   : > { %s1817_s13 = scalar_lea.sflag [#allocation9], %s417_s27  ;;  %s1278_s29 = scalar_lea.vmem %s1808_s19, 256 }
 0x2fa   : > { %p1279_p10 = scmp.ne.s32.totalorder %s1808_s19, %s1278_s29 }
 0x2fd   : > { %s758_s24 = smul.u32 %s1396_s0, %s1933_s17  ;;  %p1937_p0 = scmp.ne.s32.totalorder %s1934_s18, 0 }
 0x2fe   : > { %s1936_s1 = smov %s1935_s10  ;;  %s1427_s0 = smov [#allocation15]  }
 0x2ff   : > { %s946_s7 = sshll.u32 %s758_s24, 8  ;;  %p1280_p13 = pnand %p1279_p10, %p1937_p0 }
 0x300   : > { %s1813_s28 = scalar_lea.hbm %s1935_s10, %s946_s7  ;;  %s1282_s8 = sshll.u32 %s1427_s0, 4  ;;  %s1283_s8 = int_to_ptr.vmem [resolvable:$false] %s1282_s8 }
 0x301   : > { %p1281_p3 = pneg %p1280_p13  ;;  %s1284_s3 = scalar_lea.vmem %s1283_s8, 512 }
 0x302   : > { %p1285_p6 = scmp.lt.s32.totalorder %s1808_s19, %s1283_s8  ;;  %p1286_p1 = scmp.lt.s32.totalorder %s1284_s3, %s1278_s29 }
 0x304   : > { %p1287_p4 = por %p1286_p1, %p1285_p6 }
 0x306   : > { %p1288_p7 = pnand %p1287_p4, %p1281_p3 }
 0x308   : > { %1291 = shalt.err (!%p1288_p7)
}
 0x309   : > { %s1292_s27 = scalar_lea.hbm %s1813_s28, 256  ;;  %s1296_s5 = scalar_lea.hbm %s1936_s1, 1024 }
 0x30a   : > { %p1293_p9 = scmp.ne.s32.totalorder %s1813_s28, %s1292_s27  ;;  %p1297_p8 = scmp.lt.u32.totalorder %s1813_s28, %s1936_s1 }
 0x30b   : > { %p1298_p12 = scmp.lt.u32.totalorder %s1296_s5, %s1292_s27  ;;  %p1300_p10 = scmp.lt.u32.totalorder %s1292_s27, %s1813_s28 }
 0x30c   : > { %p1294_p11 = pnand %p1293_p9, %p1937_p0 }
 0x30d   : > { %p1299_p2 = por %p1298_p12, %p1297_p8 }
 0x30e   : > { %p1295_p5 = pneg %p1294_p11 }
 0x30f   : > { %p1301_p13 = por %p1300_p10, %p1299_p2 }
 0x311   : > { %p1302_p3 = pnand %p1301_p13, %p1295_p5 }
 0x313   : > { %1305 = shalt.err (!%p1302_p3)
}
 0x314   : > { %s1428_s17 = smov 128   ;;  %s1429_s24 = smov 8  }
 0x315   : > { %1017 = dma.vmem_to_hbm [thread:$0]  (%p1937_p0), %s1808_s19, 256, %s1813_s28, %s1817_s13, %s1428_s17, %s1428_s17, %s1429_s24  }
 0x316 PF: > { %s1938_s7 = sld [smem:[#allocation21_spill]]  ;;  %s1939_s22 = sld [smem:[#allocation26_spill]] }
 0x317   : > { %p1042_p6 = scmp.ge.s32.totalorder %s1412_s16, 2 }
 0x31c   : > { %s780_s25 = sand.u32 1, %s1938_s7   ;;  %p1940_p1 = scmp.ne.s32.totalorder %s1939_s22, 0 }
 0x31d   : > { %s781_s10 = scalar_lea.sflag [#allocation9], %s780_s25 }
 0x31e   : > { %p1034_p4 = pnand %p1042_p6, %p1940_p1 }
 0x320   : > { %1367 = dma.done.wait (!%p1034_p4), %s781_s10, 256  }
 0x321   : > { %1369 = vsyncadd (!%p1034_p4), %s781_s10, 4294967040  ;;  %s29_s16 = sadd.s32 1, %s1412_s16   ;;  %s1941_s0 = sld [smem:[#allocation23_spill]] }
 0x322   : > { %p26_p7 = scmp.ge.s32.totalorder %s29_s16, 10   ;;  %s1942_s13 = sld [smem:[#allocation24_spill]] }
 0x323   : > { %s1943_s29 = smov %s1376_s30  ;;  %s1944_s30 = smov %s1380_s9 }
 0x324   : > { %s1945_s9 = smov %s1654_s6  ;;  %s1946_s10 = smov %s1388_s11 }
 0x325   : > { %s1947_s11 = smov %s1392_s12  ;;  %s1948_s12 = smov %s1657_s15 }
 0x326   : > { %s1949_s14 = smov %s1952_s21  ;;  %s1950_s15 = smov %s1956_s26 }
 0x327   :  { %28 = sbr.rel (!%p26_p7) target bundleno = 21 (0x15), region = 136 }
 0x32e   :  { %786 = vsyncpa [#allocation8], 1 }
 0x32f   :  { %788 = vsyncpa [#allocation8 + $0x1], 1 }
 0x330   :  { %789 = vsyncpa [#allocation11], 1 }
 0x331   :  { %791 = vsyncpa [#allocation11 + $0x1], 1 }
 0x332   :  { %792 = vsyncpa [#allocation14], 1 }
 0x333   :  { %793 = vsyncpa [#allocation9], 1 }
 0x334   :  { %795 = vsyncpa [#allocation9 + $0x1], 1 }

</bundles_post_ra>
